<compile_context>
chip_gen: v7x
topology: tpu7x:2x2x1
jax: 0.10.0
libtpu: 0.0.40
codegen_flags: <defaults>
</compile_context>

<pallas_src>
import jax
import jax.numpy as jnp
from jax import lax
from jax.experimental import pallas as pl
from jax.experimental.pallas import tpu as pltpu

EPS = 1e-5

_TARGET_BLOCK_BYTES = 2 * 1024 * 1024   # ~2 MiB input block -> near HBM roofline
_VMEM_LIMIT_BYTES = 32 * 1024 * 1024    # headroom vs v5e's 16 MiB default; safe on v6e/v7x


def _ln_packed_kernel(x_ref, g_ref, b_ref, m_ref, o_ref):
    """Lane-dense LayerNorm: each 128-wide row packs P logical rows of D feats.

    m_ref is a (W, W) block-diagonal averaging matrix (1/D inside each DxD
    diagonal block): a single MXU matmul broadcasts each segment's mean to all
    lanes of that segment, so no cross-lane reductions are needed.
    """
    x = x_ref[...].astype(jnp.float32)                              # (rows, W), f32 stats
    m = m_ref[...]                                                  # (W, W)
    mean = jnp.dot(x, m, preferred_element_type=jnp.float32)        # per-segment mean
    xc = x - mean
    var = jnp.dot(xc * xc, m, preferred_element_type=jnp.float32)   # biased variance
    inv = lax.rsqrt(var + EPS)                                      # EUP rsqrt (free slot)
    o_ref[...] = (g_ref[...] * (xc * inv) + b_ref[...]).astype(o_ref.dtype)


def _ln_plain_kernel(x_ref, g_ref, b_ref, o_ref):
    """Fallback for D that can't be lane-packed (D >= 128 or 128 % D != 0)."""
    x = x_ref[...].astype(jnp.float32)
    mean = jnp.mean(x, axis=-1, keepdims=True)
    xc = x - mean
    var = jnp.mean(xc * xc, axis=-1, keepdims=True)                 # biased variance
    inv = lax.rsqrt(var + EPS)
    o_ref[...] = (g_ref[...] * (xc * inv) + b_ref[...]).astype(o_ref.dtype)


def _round_up(a, b):
    return -(-a // b) * b


def layer_norm(x, scale, shift):
    """LayerNorm over the last axis; matches the PyTorch LayerNorm module."""
    orig_shape = x.shape
    D = orig_shape[-1]
    xf = x.reshape(-1, D)                       # fuse all leading dims -> (N, D)
    N = xf.shape[0]

    # Lane-dense packing: P logical rows per 128-lane physical row.
    packed = (D < 128) and (128 % D == 0)
    P = 128 // D if packed else 1
    W = P * D

    # Pad logical rows to a multiple of P (zero rows normalize to finite
    # values and are sliced off below), then pack lane-dense (row-major
    # reshape => zero data movement when no padding is needed).
    n_pad = _round_up(N, P)
    if n_pad != N:
        xf = jnp.pad(xf, ((0, n_pad - N), (0, 0)))
    xp = xf.reshape(n_pad // P, W)
    R = xp.shape[0]

    # Block size: ~2 MiB of packed rows (multiple of 8 sublanes), decoupled
    # from divisibility -- grid = cdiv over padded rows, never a whole-array
    # fallback block.
    rows_for_target = max(8, (_TARGET_BLOCK_BYTES // (W * 4)) // 8 * 8)
    block_rows = min(rows_for_target, _round_up(R, 8))
    r_pad = _round_up(R, block_rows)
    if r_pad != R:
        xp = jnp.pad(xp, ((0, r_pad - R), (0, 0)))
    grid = (r_pad // block_rows,)

    # scale/shift tiled across the P packed segments (stats in f32 everywhere;
    # the g/b traffic is a single 1xW row, negligible).
    g = jnp.tile(scale.reshape(-1).astype(jnp.float32), P).reshape(1, W)
    b = jnp.tile(shift.reshape(-1).astype(jnp.float32), P).reshape(1, W)

    compiler_params = pltpu.CompilerParams(
        dimension_semantics=("parallel",),      # v7x: row blocks split over both TCs
        vmem_limit_bytes=_VMEM_LIMIT_BYTES,
    )

    if packed:
        # Block-diagonal averaging matrix: m[i, j] = 1/D iff lanes i, j belong
        # to the same D-wide segment.
        seg = jnp.arange(W) // D
        m = (seg[:, None] == seg[None, :]).astype(jnp.float32) / D
        out = pl.pallas_call(
            _ln_packed_kernel,
            out_shape=jax.ShapeDtypeStruct((r_pad, W), x.dtype),
            grid=grid,
            in_specs=[
                pl.BlockSpec((block_rows, W), lambda i: (i, 0)),   # packed x rows
                pl.BlockSpec((1, W), lambda i: (0, 0)),            # scale (tiled)
                pl.BlockSpec((1, W), lambda i: (0, 0)),            # shift (tiled)
                pl.BlockSpec((W, W), lambda i: (0, 0)),            # averaging matrix
            ],
            out_specs=pl.BlockSpec((block_rows, W), lambda i: (i, 0)),
            compiler_params=compiler_params,
        )(xp, g, b, m)
    else:
        out = pl.pallas_call(
            _ln_plain_kernel,
            out_shape=jax.ShapeDtypeStruct((r_pad, W), x.dtype),
            grid=grid,
            in_specs=[
                pl.BlockSpec((block_rows, W), lambda i: (i, 0)),
                pl.BlockSpec((1, W), lambda i: (0, 0)),
                pl.BlockSpec((1, W), lambda i: (0, 0)),
            ],
            out_specs=pl.BlockSpec((block_rows, W), lambda i: (i, 0)),
            compiler_params=compiler_params,
        )(xp, g, b)

    out = out[:R].reshape(n_pad, D)[:N]         # unpack lanes, drop padding
    return out.reshape(orig_shape)


def _layer_norm_ref(x, scale, shift):
    mean = jnp.mean(x, axis=-1, keepdims=True)
    var = jnp.mean((x - mean) ** 2, axis=-1, keepdims=True)
    return scale * (x - mean) / jnp.sqrt(var + EPS) + shift


if __name__ == "__main__":
    key = jax.random.PRNGKey(0)
    kx, ks, kb, kx2 = jax.random.split(key, 4)

    # Matches GPT cfg: batch=2, context_length=8, emb_dim=32.
    B, T, D = 2, 8, 32
    x = jax.random.normal(kx, (B, T, D), dtype=jnp.float32)
    scale = 1.0 + 0.1 * jax.random.normal(ks, (D,), dtype=jnp.float32)
    shift = 0.1 * jax.random.normal(kb, (D,), dtype=jnp.float32)

    ln = jax.jit(layer_norm)
    y = ln(x, scale, shift)
    jax.block_until_ready(y)

    y_ref = _layer_norm_ref(x, scale, shift)
    assert y.shape == (B, T, D), y.shape
    assert bool(jnp.all(jnp.isfinite(y)))
    assert bool(jnp.allclose(y, y_ref, atol=1e-5, rtol=1e-5)), \
        float(jnp.max(jnp.abs(y - y_ref)))

    # Non-divisible row count (exercises cdiv + padding path).
    x2 = jax.random.normal(kx2, (3, 5, D), dtype=jnp.float32)
    y2 = ln(x2, scale, shift)
    jax.block_until_ready(y2)
    y2_ref = _layer_norm_ref(x2, scale, shift)
    assert y2.shape == (3, 5, D)
    assert bool(jnp.allclose(y2, y2_ref, atol=1e-5, rtol=1e-5)), \
        float(jnp.max(jnp.abs(y2 - y2_ref)))

    print("KERNEL_OK")
</pallas_src>

<mosaic_0001>
module attributes {stable_mosaic.version = 11 : i64} {
  func.func @_ln_packed_kernel(%arg0: i32, %arg1: memref<8x128xf32, #tpu.memory_space<vmem>>, %arg2: memref<1x128xf32, #tpu.memory_space<vmem>>, %arg3: memref<1x128xf32, #tpu.memory_space<vmem>>, %arg4: memref<128x128xf32, #tpu.memory_space<vmem>>, %arg5: memref<8x128xf32, #tpu.memory_space<vmem>>) attributes {dimension_semantics = [#tpu.dimension_semantics<parallel>], iteration_bounds = array<i64: 1>, scalar_prefetch = 0 : i64, scratch_operands = 0 : i64, tpu.core_type = #tpu.core_type<tc>, window_params = [{transform_indices = @transform_0, window_bounds = array<i64: 8, 128>}, {pipeline_mode = #tpu.pipeline_mode<synchronous>, transform_indices = @transform_1, window_bounds = array<i64: 1, 128>}, {pipeline_mode = #tpu.pipeline_mode<synchronous>, transform_indices = @transform_2, window_bounds = array<i64: 1, 128>}, {pipeline_mode = #tpu.pipeline_mode<synchronous>, transform_indices = @transform_3, window_bounds = array<i64: 128, 128>}, {transform_indices = @transform_4, window_bounds = array<i64: 8, 128>}]} {
    %c0 = arith.constant 0 : index
    %c0_0 = arith.constant 0 : index
    %0 = vector.load %arg1[%c0, %c0_0] : memref<8x128xf32, #tpu.memory_space<vmem>>, vector<8x128xf32>
    %c0_1 = arith.constant 0 : index
    %c0_2 = arith.constant 0 : index
    %1 = vector.load %arg4[%c0_1, %c0_2] : memref<128x128xf32, #tpu.memory_space<vmem>>, vector<128x128xf32>
    %cst = arith.constant dense<0.000000e+00> : vector<8x128xf32>
    %2 = tpu.matmul %0, %1, %cst {dimension_numbers = #tpu.dot_dimension_numbers<[1], [0], [0], [1], [0, 0, 1, 1], [], []>} : vector<8x128xf32>, vector<128x128xf32>, vector<8x128xf32> -> vector<8x128xf32>
    %3 = arith.subf %0, %2 : vector<8x128xf32>
    %4 = arith.mulf %3, %3 : vector<8x128xf32>
    %cst_3 = arith.constant dense<0.000000e+00> : vector<8x128xf32>
    %5 = tpu.matmul %4, %1, %cst_3 {dimension_numbers = #tpu.dot_dimension_numbers<[1], [0], [0], [1], [0, 0, 1, 1], [], []>} : vector<8x128xf32>, vector<128x128xf32>, vector<8x128xf32> -> vector<8x128xf32>
    %cst_4 = arith.constant 9.99999974E-6 : f32
    %6 = vector.broadcast %cst_4 : f32 to vector<8x128xf32>
    %7 = arith.addf %5, %6 : vector<8x128xf32>
    %8 = math.rsqrt %7 : vector<8x128xf32>
    %c0_5 = arith.constant 0 : index
    %c0_6 = arith.constant 0 : index
    %9 = vector.load %arg2[%c0_5, %c0_6] : memref<1x128xf32, #tpu.memory_space<vmem>>, vector<1x128xf32>
    %10 = arith.mulf %3, %8 : vector<8x128xf32>
    %11 = vector.broadcast %9 : vector<1x128xf32> to vector<8x128xf32>
    %12 = arith.mulf %11, %10 : vector<8x128xf32>
    %c0_7 = arith.constant 0 : index
    %c0_8 = arith.constant 0 : index
    %13 = vector.load %arg3[%c0_7, %c0_8] : memref<1x128xf32, #tpu.memory_space<vmem>>, vector<1x128xf32>
    %14 = vector.broadcast %13 : vector<1x128xf32> to vector<8x128xf32>
    %15 = arith.addf %12, %14 : vector<8x128xf32>
    %c0_9 = arith.constant 0 : index
    %c0_10 = arith.constant 0 : index
    %16 = vector.load %arg5[%c0_9, %c0_10] : memref<8x128xf32, #tpu.memory_space<vmem>>, vector<8x128xf32>
    tpu.vector_store %arg5[%c0_9, %c0_10], %15 {strides = array<i32>} : memref<8x128xf32, #tpu.memory_space<vmem>>, vector<8x128xf32>,
    return
  }
  func.func @transform_0(%arg0: i32) -> (i32, i32) {
    %c0_i32 = arith.constant 0 : i32
    %c0_i32_0 = arith.constant 0 : i32
    return %arg0, %c0_i32 : i32, i32
  }
  func.func @transform_1(%arg0: i32) -> (i32, i32) {
    %c0_i32 = arith.constant 0 : i32
    %c0_i32_0 = arith.constant 0 : i32
    %c0_i32_1 = arith.constant 0 : i32
    return %c0_i32, %c0_i32_0 : i32, i32
  }
  func.func @transform_2(%arg0: i32) -> (i32, i32) {
    %c0_i32 = arith.constant 0 : i32
    %c0_i32_0 = arith.constant 0 : i32
    %c0_i32_1 = arith.constant 0 : i32
    return %c0_i32, %c0_i32_0 : i32, i32
  }
  func.func @transform_3(%arg0: i32) -> (i32, i32) {
    %c0_i32 = arith.constant 0 : i32
    %c0_i32_0 = arith.constant 0 : i32
    %c0_i32_1 = arith.constant 0 : i32
    return %c0_i32, %c0_i32_0 : i32, i32
  }
  func.func @transform_4(%arg0: i32) -> (i32, i32) {
    %c0_i32 = arith.constant 0 : i32
    %c0_i32_0 = arith.constant 0 : i32
    return %arg0, %c0_i32 : i32, i32
  }
}

</mosaic_0001>

<bundles_post_ra>
// kernel: tile.13
= control target key start
LH: loop header
LB: loop body
LE: loop exit
PB: predicated region body
PF: predicated region fallthrough
CT: control target
= control target key end

     0   :  { %s22_s0 = inlined_call_operand.vmem [shape: f32[32], index: 0, kind: input, shape index: {}]   ;;  %s23_s1 = inlined_call_operand.vmem [shape: f32[4,32], index: 1, kind: output, shape index: {}]  }
   0x1   :  { %v4_v0 = vld [vmem:[%s22_s0] ss:$0 sm:$0xff] }
   0x2   :  { %5 = vst [vmem:[%s23_s1] sm:$0xf] %v4_v0 }

// kernel: tile.14
= control target key start
LH: loop header
LB: loop body
LE: loop exit
PB: predicated region body
PF: predicated region fallthrough
CT: control target
= control target key end

     0   :  { %vm7_vm0 = vcmask 261120   ;;  %s37_s8 = smov 32   ;;  %s38_s9 = smov 64   ;;  %vm13_vm1 = vcmask 1048320   ;;  %vm19_vm2 = vcmask 785920   ;;  %vm25_vm3 = vcmask 523520   ;;  %s55_s0 = inlined_call_operand.vmem [shape: f32[4,32], index: 0, kind: input, shape index: {}]   ;;  %s56_s1 = inlined_call_operand.vmem [shape: f32[1,128], index: 1, kind: output, shape index: {}]  }
   0x1   :  { %v4_v0 = vld [vmem:[%s55_s0] sm:$0xf]  ;;  %s36_s0 = smov 96  }
   0x2   :  { %5 = vst [vmem:[#allocation1] sm:$0xf] %v4_v0 }
   0x9   :  { %v10_v1 = vld [vmem:[#allocation1 + $0x3] sm:$0x1]   ;;  %v22_v2 = vld [vmem:[#allocation1 + $0x1] sm:$0x1]   ;;  %v6_v3 = vld [vmem:[#allocation1] sm:$0x1]  }
   0xa   :  { %11 = vrot.lane.b32.xlu0 %v10_v1, %s36_s0  ;;  %23 = vrot.lane.b32.xlu1 %v22_v2, %s37_s8  ;;  %v16_v4 = vld [vmem:[#allocation1 + $0x2] sm:$0x1]   ;;  %8 = vst.msk [vmem:[#allocation0] sm:$0x1] %vm7_vm0, %v6_v3  }
   0xe   :  { %17 = vrot.lane.b32.xlu0 %v16_v4, %s38_s9 }
  0x7c   :  { %v12_v5 = vpop.permute.xlu0 %11   ;;  %v24_v6 = vpop.permute.xlu1 %23  }
  0x7d   :  { %14 = vst.msk [vmem:[#allocation0] sm:$0x1] %vm13_vm1, %v12_v5  }
  0x80   :  { %v18_v7 = vpop.permute.xlu0 %17  }
  0x81   :  { %20 = vst.msk [vmem:[#allocation0] sm:$0x1] %vm19_vm2, %v18_v7  }
  0x82   :  { %26 = vst.msk [vmem:[#allocation0] sm:$0x1] %vm25_vm3, %v24_v6  }
  0x89   :  { %v30_v8 = vld [vmem:[#allocation0] sm:$0x1] }
  0x8a   :  { %32 = vst [vmem:[%s56_s1] sm:$0x1] %v30_v8 }

// kernel: layer_norm.1
= control target key start
LH: loop header
LB: loop body
LE: loop exit
PB: predicated region body
PF: predicated region fallthrough
CT: control target
= control target key end

     0   :  { %v358_v0 = vmov 0.0|0.0   ;;  %vm359_vm0 = vmmov 0   ;;  %v360_v4 = vmov 0.0   ;;  %s446_s3 = inlined_call_operand.vmem [shape: f32[128,128], index: 3, kind: input, shape index: {}]   ;;  %s447_s0 = inlined_call_operand.vmem [shape: f32[8,128], index: 0, kind: input, shape index: {}]   ;;  %s448_s1 = inlined_call_operand.vmem [shape: f32[1,128], index: 1, kind: input, shape index: {}]   ;;  %s449_s2 = inlined_call_operand.vmem [shape: f32[1,128], index: 2, kind: input, shape index: {}]   ;;  %s450_s4 = inlined_call_operand.vmem [shape: f32[8,128], index: 4, kind: output, shape index: {}]  }
   0x1   :  { %305 = vmatprep.subr.bf16.mxu0 %v358_v0  ;;  %v18_v1 = vld [vmem:[%s446_s3] sm:$0xff]  ;;  %v19_v2 = vld [vmem:[%s446_s3 + $0x8] sm:$0xff]  ;;  %v20_v3 = vld [vmem:[%s446_s3 + $0x10] sm:$0xff]  ;;  %267 = vmatprep.mubr.msk.f32.mxu0 %vm359_vm0, %v360_v4 }
   0x2   :  { %v306_v5 = vpack.c.bf16 %v19_v2, %v18_v1  ;;  %v21_v6 = vld [vmem:[%s446_s3 + $0x18] sm:$0xff]  ;;  %329 = vmatprep.subr.bf16.mxu1 %v358_v0  ;;  %302 = vmatprep.mubr.msk.f32.mxu1 %vm359_vm0, %v360_v4  ;;  %v22_v8 = vld [vmem:[%s446_s3 + $0x20] sm:$0xff]  ;;  %v23_v9 = vld [vmem:[%s446_s3 + $0x28] sm:$0xff] }
   0x3   :  { %v309_v7 = vpack.c.bf16 %v21_v6, %v20_v3  ;;  %v312_v10 = vpack.c.bf16 %v23_v9, %v22_v8  ;;  %v24_v11 = vld [vmem:[%s446_s3 + $0x30] sm:$0xff]  ;;  %v25_v12 = vld [vmem:[%s446_s3 + $0x38] sm:$0xff]  ;;  %v26_v14 = vld [vmem:[%s446_s3 + $0x40] sm:$0xff] }
   0x4   :  { %307 = vmatpush3.bf16.msra.mxu0 %v306_v5  ;;  %331 = vmatpush3.bf16.msra.mxu1 %v306_v5  ;;  %v315_v13 = vpack.c.bf16 %v25_v12, %v24_v11  ;;  %v27_v15 = vld [vmem:[%s446_s3 + $0x48] sm:$0xff]  ;;  %v28_v17 = vld [vmem:[%s446_s3 + $0x50] sm:$0xff]  ;;  %v29_v18 = vld [vmem:[%s446_s3 + $0x58] sm:$0xff] }
   0x5   :  { %308 = vmatprep.subr.bf16.mxu0 %v358_v0  ;;  %332 = vmatprep.subr.bf16.mxu1 %v358_v0  ;;  %v318_v16 = vpack.c.bf16 %v27_v15, %v26_v14  ;;  %v321_v19 = vpack.c.bf16 %v29_v18, %v28_v17  ;;  %v30_v20 = vld [vmem:[%s446_s3 + $0x60] sm:$0xff]  ;;  %v31_v21 = vld [vmem:[%s446_s3 + $0x68] sm:$0xff]  ;;  %v32_v23 = vld [vmem:[%s446_s3 + $0x70] sm:$0xff] }
   0x6   :  { %v324_v22 = vpack.c.bf16 %v31_v21, %v30_v20  ;;  %v33_v24 = vld [vmem:[%s446_s3 + $0x78] sm:$0xff]  ;;  %v17_v26 = vld [vmem:[%s447_s0] sm:$0xff] }
   0x7   :  { %v327_v25 = vpack.c.bf16 %v33_v24, %v32_v23  ;;  %v199_v35 = vld [vmem:[%s448_s1] ss:$0 sm:$0xff] }
   0x8   :  { %310 = vmatpush3.bf16.msra.mxu0 %v309_v7  ;;  %334 = vmatpush3.bf16.msra.mxu1 %v309_v7  ;;  %v200_v37 = vld [vmem:[%s449_s2] ss:$0 sm:$0xff] }
   0x9   :  { %311 = vmatprep.subr.bf16.mxu0 %v358_v0  ;;  %335 = vmatprep.subr.bf16.mxu1 %v358_v0 }
   0xc   :  { %313 = vmatpush3.bf16.msra.mxu0 %v312_v10  ;;  %337 = vmatpush3.bf16.msra.mxu1 %v312_v10 }
   0xd   :  { %314 = vmatprep.subr.bf16.mxu0 %v358_v0  ;;  %338 = vmatprep.subr.bf16.mxu1 %v358_v0 }
  0x10   :  { %316 = vmatpush3.bf16.msra.mxu0 %v315_v13  ;;  %340 = vmatpush3.bf16.msra.mxu1 %v315_v13 }
  0x11   :  { %317 = vmatprep.subr.bf16.mxu0 %v358_v0  ;;  %341 = vmatprep.subr.bf16.mxu1 %v358_v0 }
  0x14   :  { %319 = vmatpush3.bf16.msra.mxu0 %v318_v16  ;;  %343 = vmatpush3.bf16.msra.mxu1 %v318_v16 }
  0x15   :  { %320 = vmatprep.subr.bf16.mxu0 %v358_v0  ;;  %344 = vmatprep.subr.bf16.mxu1 %v358_v0 }
  0x18   :  { %322 = vmatpush3.bf16.msra.mxu0 %v321_v19  ;;  %346 = vmatpush3.bf16.msra.mxu1 %v321_v19 }
  0x19   :  { %323 = vmatprep.subr.bf16.mxu0 %v358_v0  ;;  %347 = vmatprep.subr.bf16.mxu1 %v358_v0 }
  0x1c   :  { %325 = vmatpush3.bf16.msra.mxu0 %v324_v22  ;;  %349 = vmatpush3.bf16.msra.mxu1 %v324_v22 }
  0x1d   :  { %326 = vmatprep.subr.bf16.mxu0 %v358_v0  ;;  %350 = vmatprep.subr.bf16.mxu1 %v358_v0 }
  0x20   :  { %328 = vmatpush3.bf16.msra.mxu0 %v327_v25  ;;  %352 = vmatpush3.bf16.msra.mxu1 %v327_v25 }
  0x23   :  { %268 = vmatmul.mubr.f32.vlgmr.msra.gmra.mrb[0].mxu0 %v17_v26 }
  0xf6   :  { %v100_v27 = vpop.f32.mrb[0].mxu0 }
  0xf7   :  { %v104_v28 = vsub.f32 %v17_v26, %v100_v27  ;;  %v269_v29 = vpop.f32.mrb[1].mxu0 }
  0xf9   :  { %v105_v30 = vmul.f32 %v104_v28, %v104_v28 }
  0xfb   :  { %303 = vmatmul.mubr.f32.vlgmr.msra.gmra.mrb[0].mxu1 %v105_v30 }
 0x1ce   :  { %v172_v31 = vpop.f32.mrb[0].mxu1 }
 0x1cf   :  { %v173_v32 = vadd.f32 1e-05, %v172_v31  ;;  %v304_v33 = vpop.f32.mrb[1].mxu1 }
 0x1d1   :  { %356 = vrsqrt.f32 %v173_v32 }
 0x1db   :  { %v357_v34 = vpop.eup %356 }
 0x1dc   :  { %v178_v36 = vmul.f32 %v357_v34, %v104_v28 }
 0x1de   :  { %v185_v38 = vmul.f32 %v199_v35, %v178_v36 }
 0x1e0   :  { %v193_v39 = vadd.f32 %v200_v37, %v185_v38 }
 0x1e2   :  { %194 = vst [vmem:[%s450_s4] sm:$0xff] %v193_v39 }

</bundles_post_ra>
